<compile_context>
chip_gen: v5e
topology: v5e:2x2
jax: 0.10.0
libtpu: 0.0.40
codegen_flags: <defaults>
</compile_context>

<pallas_src>
import math

import jax
import jax.numpy as jnp
from jax.experimental import pallas as pl
from jax.experimental.pallas import tpu as pltpu

LN_EPS = 1e-5
LANE = 128
SUBLANE = 8

_VMEM_LIMIT = 48 * 1024 * 1024        # <= v7x 64 MiB physical, << v5e/v6e 128 MiB
_RESIDENT_BUDGET = 40 * 1024 * 1024   # above this, fall back to streamed weights


def _round_up(x, m):
    return ((x + m - 1) // m) * m


# ------------------------------- LN helper ---------------------------------

def _ln_relu(h, gamma, beta, inv_dim):
    """LayerNorm (E[x^2]-mu^2 form) + ReLU over the last axis, f32 math.

    Padded lanes of `h` are exactly zero, so both sums are exact w.r.t. the
    true dim (inv_dim = 1/true_dim).  gamma/beta are zero in padded lanes, so
    padded outputs stay zero through the affine + ReLU.
    """
    s1 = jnp.sum(h, axis=-1, keepdims=True)
    s2 = jnp.sum(h * h, axis=-1, keepdims=True)
    mu = s1 * inv_dim
    var = s2 * inv_dim - mu * mu
    inv = jax.lax.rsqrt(var + LN_EPS)
    return jnp.maximum((h - mu) * inv * gamma + beta, 0.0)


# ----------------------------- Pallas kernels ------------------------------

def _make_resident_kernel(hidden, depth, has_head):
    """grid=(row_tiles,). Whole weight stack resident in VMEM; in-kernel
    fori_loop over residual layers; optional head fused."""
    inv_h = 1.0 / hidden

    def stack(x_ref, w_in_ref, g_in_ref, b_in_ref,
              w1_ref, w2_ref, g1_ref, b1_ref, g2_ref, b2_ref):
        # h = relu(LayerNorm(x @ W_in))
        h = jnp.dot(x_ref[...], w_in_ref[...], preferred_element_type=jnp.float32)
        h = _ln_relu(h, g_in_ref[...], b_in_ref[...], inv_h)

        def layer(l, h):
            # out = relu(LN1(h)) @ W1   (dropout rate 0.0 -> identity)
            # out = relu(LN2(out)) @ W2
            # h   = relu(out + h)
            y = _ln_relu(h, g1_ref[l], b1_ref[l], inv_h).astype(jnp.bfloat16)
            y = jnp.dot(y, w1_ref[l], preferred_element_type=jnp.float32)
            y = _ln_relu(y, g2_ref[l], b2_ref[l], inv_h).astype(jnp.bfloat16)
            y = jnp.dot(y, w2_ref[l], preferred_element_type=jnp.float32)
            return jnp.maximum(y + h, 0.0)

        return jax.lax.fori_loop(0, depth, layer, h)

    if has_head:
        def kernel(x_ref, w_in_ref, g_in_ref, b_in_ref,
                   w1_ref, w2_ref, g1_ref, b1_ref, g2_ref, b2_ref,
                   w_out_ref, g_out_ref, b_out_ref, o_ref):
            h = stack(x_ref, w_in_ref, g_in_ref, b_in_ref,
                      w1_ref, w2_ref, g1_ref, b1_ref, g2_ref, b2_ref)
            y = _ln_relu(h, g_out_ref[...], b_out_ref[...], inv_h)
            y = y.astype(jnp.bfloat16)
            o_ref[...] = jnp.dot(y, w_out_ref[...],
                                 preferred_element_type=jnp.float32)
    else:
        def kernel(x_ref, w_in_ref, g_in_ref, b_in_ref,
                   w1_ref, w2_ref, g1_ref, b1_ref, g2_ref, b2_ref, o_ref):
            o_ref[...] = stack(x_ref, w_in_ref, g_in_ref, b_in_ref,
                               w1_ref, w2_ref, g1_ref, b1_ref, g2_ref, b2_ref)

    return kernel


def _make_streamed_kernel(hidden, depth, has_head):
    """grid=(row_tiles, depth+1). Per-layer weights streamed; activation lives
    in a VMEM scratch; head fused under pl.when(l == depth)."""
    inv_h = 1.0 / hidden
    last = depth   # l=0 input projection, l=1..depth residual layers

    def step(l, x_ref, w_in_ref, g_in_ref, b_in_ref,
             w1_ref, w2_ref, g1_ref, b1_ref, g2_ref, b2_ref, h_scr):
        @pl.when(l == 0)
        def _():
            h = jnp.dot(x_ref[...], w_in_ref[...],
                        preferred_element_type=jnp.float32)
            h_scr[...] = _ln_relu(h, g_in_ref[...], b_in_ref[...], inv_h)

        @pl.when(l > 0)
        def _():
            h = h_scr[...]
            y = _ln_relu(h, g1_ref[...], b1_ref[...], inv_h).astype(jnp.bfloat16)
            y = jnp.dot(y, w1_ref[...], preferred_element_type=jnp.float32)
            y = _ln_relu(y, g2_ref[...], b2_ref[...], inv_h).astype(jnp.bfloat16)
            y = jnp.dot(y, w2_ref[...], preferred_element_type=jnp.float32)
            h_scr[...] = jnp.maximum(y + h, 0.0)

    if has_head:
        def kernel(x_ref, w_in_ref, g_in_ref, b_in_ref,
                   w1_ref, w2_ref, g1_ref, b1_ref, g2_ref, b2_ref,
                   w_out_ref, g_out_ref, b_out_ref, o_ref, h_scr):
            l = pl.program_id(1)
            step(l, x_ref, w_in_ref, g_in_ref, b_in_ref,
                 w1_ref, w2_ref, g1_ref, b1_ref, g2_ref, b2_ref, h_scr)

            @pl.when(l == last)
            def _():
                y = _ln_relu(h_scr[...], g_out_ref[...], b_out_ref[...], inv_h)
                y = y.astype(jnp.bfloat16)
                o_ref[...] = jnp.dot(y, w_out_ref[...],
                                     preferred_element_type=jnp.float32)
    else:
        def kernel(x_ref, w_in_ref, g_in_ref, b_in_ref,
                   w1_ref, w2_ref, g1_ref, b1_ref, g2_ref, b2_ref,
                   o_ref, h_scr):
            l = pl.program_id(1)
            step(l, x_ref, w_in_ref, g_in_ref, b_in_ref,
                 w1_ref, w2_ref, g1_ref, b1_ref, g2_ref, b2_ref, h_scr)

            @pl.when(l == last)
            def _():
                o_ref[...] = h_scr[...]

    return kernel


# ------------------------------ parameter init -----------------------------

def _init_linear_padded(key, in_f, out_f, in_pad, out_pad):
    # Matches weight_initializer on torch weight of shape (out, in):
    # fan_avg = 0.5*(in+out), std = sqrt(1/fan_avg/10), truncated at +/- 2*std.
    fan_avg = 0.5 * (in_f + out_f)
    std = math.sqrt(1.0 / fan_avg / 10.0)
    w = jax.random.truncated_normal(key, -2.0, 2.0, (out_f, in_f),
                                    dtype=jnp.float32) * std
    w_pad = jnp.zeros((in_pad, out_pad), jnp.float32).at[:in_f, :out_f].set(w.T)
    return w_pad.astype(jnp.bfloat16)          # bf16 weights (MXU-native)


def _init_ln_padded(width, width_pad):
    g = jnp.zeros((1, width_pad), jnp.float32).at[:, :width].set(1.0)
    b = jnp.zeros((1, width_pad), jnp.float32)
    return g, b


def init_mlp_params(key, feature_dim, depth=10, output_dims=None):
    hidden = feature_dim * 2
    f_pad = _round_up(feature_dim, LANE)
    h_pad = _round_up(hidden, LANE)
    slots = max(depth, 1)                      # >=1 slot so stacks are non-empty

    keys = jax.random.split(key, 2 * slots + 2)
    params = {
        "dims": (feature_dim, hidden, f_pad, h_pad, depth, output_dims),
        "w_in": _init_linear_padded(keys[0], feature_dim, hidden, f_pad, h_pad),
    }
    params["g_in"], params["b_in"] = _init_ln_padded(hidden, h_pad)

    # No dummy slot 0 anymore: layer d lives at index d.
    w1, w2, g1, b1, g2, b2 = [], [], [], [], [], []
    for d in range(depth):
        w1.append(_init_linear_padded(keys[1 + 2 * d], hidden, hidden, h_pad, h_pad))
        w2.append(_init_linear_padded(keys[2 + 2 * d], hidden, hidden, h_pad, h_pad))
        g, b = _init_ln_padded(hidden, h_pad)
        g1.append(g); b1.append(b)
        g, b = _init_ln_padded(hidden, h_pad)
        g2.append(g); b2.append(b)
    while len(w1) < slots:                     # only hit when depth == 0
        z2 = jnp.zeros((h_pad, h_pad), jnp.bfloat16)
        z1 = jnp.zeros((1, h_pad), jnp.float32)
        w1.append(z2); w2.append(z2)
        g1.append(z1); b1.append(z1); g2.append(z1); b2.append(z1)

    params["w1"] = jnp.stack(w1)               # (slots, h_pad, h_pad) bf16
    params["w2"] = jnp.stack(w2)
    params["g1"] = jnp.stack(g1)               # (slots, 1, h_pad) f32
    params["b1"] = jnp.stack(b1)
    params["g2"] = jnp.stack(g2)
    params["b2"] = jnp.stack(b2)

    if output_dims is not None:
        o_pad = _round_up(output_dims, LANE)
        params["w_out"] = _init_linear_padded(keys[-1], hidden, output_dims,
                                              h_pad, o_pad)
        params["g_out"], params["b_out"] = _init_ln_padded(hidden, h_pad)
        params["o_pad"] = o_pad
    return params


# --------------------------------- tiling ----------------------------------

def _pick_row_tile(n, tm_req):
    """Row tile: multiple of 8 (128 when rows allow), no near-empty last
    tiles, and >=2 row tiles when rows >= 256 (v7x has 2 TensorCores)."""
    n8 = _round_up(n, SUBLANE)
    tm = max(SUBLANE, (tm_req // SUBLANE) * SUBLANE)
    if n8 >= 2 * LANE:
        half = max(LANE, (((n8 + 1) // 2) // LANE) * LANE)
        tm = max(LANE, min((tm // LANE) * LANE, half))
    else:
        tm = min(tm, n8)
    n_pad = _round_up(n8, tm)
    return tm, n_pad


def _resident_vmem_bytes(tm, f_pad, h_pad, o_pad, out_w, slots):
    """Rough double-buffered VMEM footprint of the resident-weight kernel."""
    b = 2 * tm * f_pad * 2                      # x tile (bf16)
    b += 2 * f_pad * h_pad * 2                  # w_in
    b += 2 * 2 * slots * h_pad * h_pad * 2      # w1 + w2 stacks
    b += 2 * 6 * slots * h_pad * 4              # LN params
    b += 2 * tm * out_w * 4                     # output tile (f32)
    if o_pad:
        b += 2 * h_pad * o_pad * 2              # head weights
    b += 8 * tm * h_pad * 4                     # body temporaries / spill headroom
    return b


# --------------------------------- forward ---------------------------------

def mlp_forward(params, x, tm=512, force_streamed=False):
    feature_dim, hidden, f_pad, h_pad, depth, output_dims = params["dims"]
    n, f = x.shape
    assert f == feature_dim
    has_head = output_dims is not None
    o_pad = params.get("o_pad")
    out_w = o_pad if has_head else h_pad
    slots = params["w1"].shape[0]

    tm_eff, n_pad = _pick_row_tile(n, tm)

    # TODO(synk): for very large n, accept bf16 input and pad rows only
    # (this pad/cast is a separate XLA pass: one extra HBM read+write of x).
    x_pad = jnp.zeros((n_pad, f_pad), jnp.bfloat16)
    x_pad = x_pad.at[:n, :feature_dim].set(x.astype(jnp.bfloat16))

    row2 = lambda i, *_: (i, 0)       # row-tiled
    bcast2 = lambda i, *_: (0, 0)     # broadcast params
    all3 = lambda i, *_: (0, 0, 0)    # whole stacked-weight block

    inputs = [x_pad, params["w_in"], params["g_in"], params["b_in"],
              params["w1"], params["w2"], params["g1"], params["b1"],
              params["g2"], params["b2"]]
    head_specs = []
    if has_head:
        inputs += [params["w_out"], params["g_out"], params["b_out"]]
        head_specs = [pl.BlockSpec((h_pad, o_pad), bcast2),
                      pl.BlockSpec((1, h_pad), bcast2),
                      pl.BlockSpec((1, h_pad), bcast2)]

    out_shape = jax.ShapeDtypeStruct((n_pad, out_w), jnp.float32)

    resident = (not force_streamed) and (
        _resident_vmem_bytes(tm_eff, f_pad, h_pad, o_pad, out_w, slots)
        <= _RESIDENT_BUDGET)

    if resident:
        # One grid step per row tile; whole weight stack resident in VMEM.
        in_specs = [
            pl.BlockSpec((tm_eff, f_pad), row2),            # x
            pl.BlockSpec((f_pad, h_pad), bcast2),           # w_in
            pl.BlockSpec((1, h_pad), bcast2),               # g_in
            pl.BlockSpec((1, h_pad), bcast2),               # b_in
            pl.BlockSpec((slots, h_pad, h_pad), all3),      # w1 stack
            pl.BlockSpec((slots, h_pad, h_pad), all3),      # w2 stack
            pl.BlockSpec((slots, 1, h_pad), all3),          # g1 stack
            pl.BlockSpec((slots, 1, h_pad), all3),          # b1 stack
            pl.BlockSpec((slots, 1, h_pad), all3),          # g2 stack
            pl.BlockSpec((slots, 1, h_pad), all3),          # b2 stack
        ] + head_specs
        out = pl.pallas_call(
            _make_resident_kernel(hidden, depth, has_head),
            out_shape=out_shape,
            grid=(n_pad // tm_eff,),
            in_specs=in_specs,
            out_specs=pl.BlockSpec((tm_eff, out_w), row2),
            compiler_params=pltpu.CompilerParams(
                dimension_semantics=("parallel",),
                vmem_limit_bytes=_VMEM_LIMIT),
        )(*inputs)
    else:
        # Streamed-weight fallback: per-layer weights DMA'd per depth step.
        # TODO(synk): for h_pad large enough that even a single layer's
        # (w1, w2) blocks blow the VMEM budget (~>1280 on v7x), add K/N tiling
        # of w1/w2 with an accumulator + pl.when init/finalize.
        stack3 = lambda i, l: (jnp.maximum(l - 1, 0), 0, 0)   # no dummy slot
        in_specs = [
            pl.BlockSpec((tm_eff, f_pad), row2),            # x
            pl.BlockSpec((f_pad, h_pad), bcast2),           # w_in
            pl.BlockSpec((1, h_pad), bcast2),               # g_in
            pl.BlockSpec((1, h_pad), bcast2),               # b_in
            pl.BlockSpec((None, h_pad, h_pad), stack3),     # w1[l-1]
            pl.BlockSpec((None, h_pad, h_pad), stack3),     # w2[l-1]
            pl.BlockSpec((None, 1, h_pad), stack3),         # g1[l-1]
            pl.BlockSpec((None, 1, h_pad), stack3),         # b1[l-1]
            pl.BlockSpec((None, 1, h_pad), stack3),         # g2[l-1]
            pl.BlockSpec((None, 1, h_pad), stack3),         # b2[l-1]
        ] + head_specs
        out = pl.pallas_call(
            _make_streamed_kernel(hidden, depth, has_head),
            out_shape=out_shape,
            grid=(n_pad // tm_eff, depth + 1),
            in_specs=in_specs,
            out_specs=pl.BlockSpec((tm_eff, out_w), row2),
            scratch_shapes=[pltpu.VMEM((tm_eff, h_pad), jnp.float32)],
            compiler_params=pltpu.CompilerParams(
                dimension_semantics=("parallel", "arbitrary"),
                vmem_limit_bytes=_VMEM_LIMIT),
        )(*inputs)

    width = output_dims if has_head else hidden
    return out[:n, :width]


# ----------------------------------- main -----------------------------------

if __name__ == "__main__":
    key = jax.random.PRNGKey(0)
    k_param, k_param2, k_x = jax.random.split(key, 3)

    batch = 8
    feature_dim = 32
    depth = 4

    x = jax.random.normal(k_x, (batch, feature_dim), dtype=jnp.float32)

    # Default module config: output_dims=None -> no final projection head.
    params = init_mlp_params(k_param, feature_dim, depth, output_dims=None)
    out_res = mlp_forward(params, x)                        # resident-weight path
    out_str = mlp_forward(params, x, force_streamed=True)   # streamed fallback
    jax.block_until_ready((out_res, out_str))
    assert out_res.shape == (batch, feature_dim * 2)
    assert bool(jnp.allclose(out_res, out_str, atol=2e-3, rtol=2e-3))

    # Optional output head path.
    params2 = init_mlp_params(k_param2, feature_dim, depth, output_dims=16)
    out2_res = mlp_forward(params2, x)
    out2_str = mlp_forward(params2, x, force_streamed=True)
    jax.block_until_ready((out2_res, out2_str))
    assert out2_res.shape == (batch, 16)
    assert bool(jnp.allclose(out2_res, out2_str, atol=2e-3, rtol=2e-3))

    print("KERNEL_OK")
</pallas_src>

<mosaic_0001>
module attributes {stable_mosaic.version = 11 : i64} {
  func.func @kernel(%arg0: i32, %arg1: memref<8x128xbf16, #tpu.memory_space<vmem>>, %arg2: memref<128x128xbf16, #tpu.memory_space<vmem>>, %arg3: memref<1x128xf32, #tpu.memory_space<vmem>>, %arg4: memref<1x128xf32, #tpu.memory_space<vmem>>, %arg5: memref<4x128x128xbf16, #tpu.memory_space<vmem>>, %arg6: memref<4x128x128xbf16, #tpu.memory_space<vmem>>, %arg7: memref<4x1x128xf32, #tpu.memory_space<vmem>>, %arg8: memref<4x1x128xf32, #tpu.memory_space<vmem>>, %arg9: memref<4x1x128xf32, #tpu.memory_space<vmem>>, %arg10: memref<4x1x128xf32, #tpu.memory_space<vmem>>, %arg11: memref<8x128xf32, #tpu.memory_space<vmem>>) attributes {dimension_semantics = [#tpu.dimension_semantics<parallel>], iteration_bounds = array<i64: 1>, scalar_prefetch = 0 : i64, scratch_operands = 0 : i64, tpu.core_type = #tpu.core_type<tc>, window_params = [{transform_indices = @transform_0, window_bounds = array<i64: 8, 128>}, {pipeline_mode = #tpu.pipeline_mode<synchronous>, transform_indices = @transform_1, window_bounds = array<i64: 128, 128>}, {pipeline_mode = #tpu.pipeline_mode<synchronous>, transform_indices = @transform_2, window_bounds = array<i64: 1, 128>}, {pipeline_mode = #tpu.pipeline_mode<synchronous>, transform_indices = @transform_3, window_bounds = array<i64: 1, 128>}, {pipeline_mode = #tpu.pipeline_mode<synchronous>, transform_indices = @transform_4, window_bounds = array<i64: 4, 128, 128>}, {pipeline_mode = #tpu.pipeline_mode<synchronous>, transform_indices = @transform_5, window_bounds = array<i64: 4, 128, 128>}, {pipeline_mode = #tpu.pipeline_mode<synchronous>, transform_indices = @transform_6, window_bounds = array<i64: 4, 1, 128>}, {pipeline_mode = #tpu.pipeline_mode<synchronous>, transform_indices = @transform_7, window_bounds = array<i64: 4, 1, 128>}, {pipeline_mode = #tpu.pipeline_mode<synchronous>, transform_indices = @transform_8, window_bounds = array<i64: 4, 1, 128>}, {pipeline_mode = #tpu.pipeline_mode<synchronous>, transform_indices = @transform_9, window_bounds = array<i64: 4, 1, 128>}, {transform_indices = @transform_10, window_bounds = array<i64: 8, 128>}]} {
    %c0 = arith.constant 0 : index
    %c0_0 = arith.constant 0 : index
    %0 = vector.load %arg1[%c0, %c0_0] : memref<8x128xbf16, #tpu.memory_space<vmem>>, vector<8x128xbf16>
    %c0_1 = arith.constant 0 : index
    %c0_2 = arith.constant 0 : index
    %1 = vector.load %arg2[%c0_1, %c0_2] : memref<128x128xbf16, #tpu.memory_space<vmem>>, vector<128x128xbf16>
    %cst = arith.constant dense<0.000000e+00> : vector<8x128xf32>
    %2 = tpu.matmul %0, %1, %cst {dimension_numbers = #tpu.dot_dimension_numbers<[1], [0], [0], [1], [0, 0, 1, 1], [], []>} : vector<8x128xbf16>, vector<128x128xbf16>, vector<8x128xf32> -> vector<8x128xf32>
    %c0_3 = arith.constant 0 : index
    %c0_4 = arith.constant 0 : index
    %3 = vector.load %arg3[%c0_3, %c0_4] : memref<1x128xf32, #tpu.memory_space<vmem>>, vector<1x128xf32>
    %c0_5 = arith.constant 0 : index
    %c0_6 = arith.constant 0 : index
    %4 = vector.load %arg4[%c0_5, %c0_6] : memref<1x128xf32, #tpu.memory_space<vmem>>, vector<1x128xf32>
    %cst_7 = arith.constant dense<0.000000e+00> : vector<8xf32>
    %5 = vector.multi_reduction <add>, %2, %cst_7 [1] : vector<8x128xf32> to vector<8xf32>
    %6 = vector.shape_cast %5 : vector<8xf32> to vector<8x1xf32>
    %7 = arith.mulf %2, %2 : vector<8x128xf32>
    %cst_8 = arith.constant dense<0.000000e+00> : vector<8xf32>
    %8 = vector.multi_reduction <add>, %7, %cst_8 [1] : vector<8x128xf32> to vector<8xf32>
    %9 = vector.shape_cast %8 : vector<8xf32> to vector<8x1xf32>
    %cst_9 = arith.constant 1.562500e-02 : f32
    %10 = vector.broadcast %cst_9 : f32 to vector<8x1xf32>
    %11 = arith.mulf %6, %10 : vector<8x1xf32>
    %cst_10 = arith.constant 1.562500e-02 : f32
    %12 = vector.broadcast %cst_10 : f32 to vector<8x1xf32>
    %13 = arith.mulf %9, %12 : vector<8x1xf32>
    %14 = arith.mulf %11, %11 : vector<8x1xf32>
    %15 = arith.subf %13, %14 : vector<8x1xf32>
    %cst_11 = arith.constant 9.99999974E-6 : f32
    %16 = vector.broadcast %cst_11 : f32 to vector<8x1xf32>
    %17 = arith.addf %15, %16 : vector<8x1xf32>
    %18 = math.rsqrt %17 : vector<8x1xf32>
    %19 = vector.broadcast %11 : vector<8x1xf32> to vector<8x128xf32>
    %20 = arith.subf %2, %19 : vector<8x128xf32>
    %21 = vector.broadcast %18 : vector<8x1xf32> to vector<8x128xf32>
    %22 = arith.mulf %20, %21 : vector<8x128xf32>
    %23 = vector.broadcast %3 : vector<1x128xf32> to vector<8x128xf32>
    %24 = arith.mulf %22, %23 : vector<8x128xf32>
    %25 = vector.broadcast %4 : vector<1x128xf32> to vector<8x128xf32>
    %26 = arith.addf %24, %25 : vector<8x128xf32>
    %cst_12 = arith.constant 0.000000e+00 : f32
    %27 = vector.broadcast %cst_12 : f32 to vector<8x128xf32>
    %28 = arith.maximumf %26, %27 : vector<8x128xf32>
    %c0_i32 = arith.constant 0 : i32
    %c4_i32 = arith.constant 4 : i32
    %29 = arith.addi %c0_i32, %c4_i32 : i32
    %c1_i32 = arith.constant 1 : i32
    %30 = scf.for %arg12 = %c0_i32 to %29 step %c1_i32 iter_args(%arg13 = %28) -> (vector<8x128xf32>)  : i32 {
      %32 = arith.index_cast %arg12 : i32 to index
      %c0_16 = arith.constant 0 : index
      %c0_17 = arith.constant 0 : index
      %33 = vector.load %arg7[%32, %c0_16, %c0_17] : memref<4x1x128xf32, #tpu.memory_space<vmem>>, vector<1x1x128xf32>
      %34 = vector.shape_cast %33 : vector<1x1x128xf32> to vector<1x128xf32>
      %35 = arith.index_cast %arg12 : i32 to index
      %c0_18 = arith.constant 0 : index
      %c0_19 = arith.constant 0 : index
      %36 = vector.load %arg8[%35, %c0_18, %c0_19] : memref<4x1x128xf32, #tpu.memory_space<vmem>>, vector<1x1x128xf32>
      %37 = vector.shape_cast %36 : vector<1x1x128xf32> to vector<1x128xf32>
      %cst_20 = arith.constant dense<0.000000e+00> : vector<8xf32>
      %38 = vector.multi_reduction <add>, %arg13, %cst_20 [1] : vector<8x128xf32> to vector<8xf32>
      %39 = vector.shape_cast %38 : vector<8xf32> to vector<8x1xf32>
      %40 = arith.mulf %arg13, %arg13 : vector<8x128xf32>
      %cst_21 = arith.constant dense<0.000000e+00> : vector<8xf32>
      %41 = vector.multi_reduction <add>, %40, %cst_21 [1] : vector<8x128xf32> to vector<8xf32>
      %42 = vector.shape_cast %41 : vector<8xf32> to vector<8x1xf32>
      %cst_22 = arith.constant 1.562500e-02 : f32
      %43 = vector.broadcast %cst_22 : f32 to vector<8x1xf32>
      %44 = arith.mulf %39, %43 : vector<8x1xf32>
      %cst_23 = arith.constant 1.562500e-02 : f32
      %45 = vector.broadcast %cst_23 : f32 to vector<8x1xf32>
      %46 = arith.mulf %42, %45 : vector<8x1xf32>
      %47 = arith.mulf %44, %44 : vector<8x1xf32>
      %48 = arith.subf %46, %47 : vector<8x1xf32>
      %cst_24 = arith.constant 9.99999974E-6 : f32
      %49 = vector.broadcast %cst_24 : f32 to vector<8x1xf32>
      %50 = arith.addf %48, %49 : vector<8x1xf32>
      %51 = math.rsqrt %50 : vector<8x1xf32>
      %52 = vector.broadcast %44 : vector<8x1xf32> to vector<8x128xf32>
      %53 = arith.subf %arg13, %52 : vector<8x128xf32>
      %54 = vector.broadcast %51 : vector<8x1xf32> to vector<8x128xf32>
      %55 = arith.mulf %53, %54 : vector<8x128xf32>
      %56 = vector.broadcast %34 : vector<1x128xf32> to vector<8x128xf32>
      %57 = arith.mulf %55, %56 : vector<8x128xf32>
      %58 = vector.broadcast %37 : vector<1x128xf32> to vector<8x128xf32>
      %59 = arith.addf %57, %58 : vector<8x128xf32>
      %cst_25 = arith.constant 0.000000e+00 : f32
      %60 = vector.broadcast %cst_25 : f32 to vector<8x128xf32>
      %61 = arith.maximumf %59, %60 : vector<8x128xf32>
      %62 = arith.truncf %61 : vector<8x128xf32> to vector<8x128xbf16>
      %63 = arith.index_cast %arg12 : i32 to index
      %c0_26 = arith.constant 0 : index
      %c0_27 = arith.constant 0 : index
      %64 = vector.load %arg5[%63, %c0_26, %c0_27] : memref<4x128x128xbf16, #tpu.memory_space<vmem>>, vector<1x128x128xbf16>
      %65 = vector.shape_cast %64 : vector<1x128x128xbf16> to vector<128x128xbf16>
      %cst_28 = arith.constant dense<0.000000e+00> : vector<8x128xf32>
      %66 = tpu.matmul %62, %65, %cst_28 {dimension_numbers = #tpu.dot_dimension_numbers<[1], [0], [0], [1], [0, 0, 1, 1], [], []>} : vector<8x128xbf16>, vector<128x128xbf16>, vector<8x128xf32> -> vector<8x128xf32>
      %67 = arith.index_cast %arg12 : i32 to index
      %c0_29 = arith.constant 0 : index
      %c0_30 = arith.constant 0 : index
      %68 = vector.load %arg9[%67, %c0_29, %c0_30] : memref<4x1x128xf32, #tpu.memory_space<vmem>>, vector<1x1x128xf32>
      %69 = vector.shape_cast %68 : vector<1x1x128xf32> to vector<1x128xf32>
      %70 = arith.index_cast %arg12 : i32 to index
      %c0_31 = arith.constant 0 : index
      %c0_32 = arith.constant 0 : index
      %71 = vector.load %arg10[%70, %c0_31, %c0_32] : memref<4x1x128xf32, #tpu.memory_space<vmem>>, vector<1x1x128xf32>
      %72 = vector.shape_cast %71 : vector<1x1x128xf32> to vector<1x128xf32>
      %cst_33 = arith.constant dense<0.000000e+00> : vector<8xf32>
      %73 = vector.multi_reduction <add>, %66, %cst_33 [1] : vector<8x128xf32> to vector<8xf32>
      %74 = vector.shape_cast %73 : vector<8xf32> to vector<8x1xf32>
      %75 = arith.mulf %66, %66 : vector<8x128xf32>
      %cst_34 = arith.constant dense<0.000000e+00> : vector<8xf32>
      %76 = vector.multi_reduction <add>, %75, %cst_34 [1] : vector<8x128xf32> to vector<8xf32>
      %77 = vector.shape_cast %76 : vector<8xf32> to vector<8x1xf32>
      %cst_35 = arith.constant 1.562500e-02 : f32
      %78 = vector.broadcast %cst_35 : f32 to vector<8x1xf32>
      %79 = arith.mulf %74, %78 : vector<8x1xf32>
      %cst_36 = arith.constant 1.562500e-02 : f32
      %80 = vector.broadcast %cst_36 : f32 to vector<8x1xf32>
      %81 = arith.mulf %77, %80 : vector<8x1xf32>
      %82 = arith.mulf %79, %79 : vector<8x1xf32>
      %83 = arith.subf %81, %82 : vector<8x1xf32>
      %cst_37 = arith.constant 9.99999974E-6 : f32
      %84 = vector.broadcast %cst_37 : f32 to vector<8x1xf32>
      %85 = arith.addf %83, %84 : vector<8x1xf32>
      %86 = math.rsqrt %85 : vector<8x1xf32>
      %87 = vector.broadcast %79 : vector<8x1xf32> to vector<8x128xf32>
      %88 = arith.subf %66, %87 : vector<8x128xf32>
      %89 = vector.broadcast %86 : vector<8x1xf32> to vector<8x128xf32>
      %90 = arith.mulf %88, %89 : vector<8x128xf32>
      %91 = vector.broadcast %69 : vector<1x128xf32> to vector<8x128xf32>
      %92 = arith.mulf %90, %91 : vector<8x128xf32>
      %93 = vector.broadcast %72 : vector<1x128xf32> to vector<8x128xf32>
      %94 = arith.addf %92, %93 : vector<8x128xf32>
      %cst_38 = arith.constant 0.000000e+00 : f32
      %95 = vector.broadcast %cst_38 : f32 to vector<8x128xf32>
      %96 = arith.maximumf %94, %95 : vector<8x128xf32>
      %97 = arith.truncf %96 : vector<8x128xf32> to vector<8x128xbf16>
      %98 = arith.index_cast %arg12 : i32 to index
      %c0_39 = arith.constant 0 : index
      %c0_40 = arith.constant 0 : index
      %99 = vector.load %arg6[%98, %c0_39, %c0_40] : memref<4x128x128xbf16, #tpu.memory_space<vmem>>, vector<1x128x128xbf16>
      %100 = vector.shape_cast %99 : vector<1x128x128xbf16> to vector<128x128xbf16>
      %cst_41 = arith.constant dense<0.000000e+00> : vector<8x128xf32>
      %101 = tpu.matmul %97, %100, %cst_41 {dimension_numbers = #tpu.dot_dimension_numbers<[1], [0], [0], [1], [0, 0, 1, 1], [], []>} : vector<8x128xbf16>, vector<128x128xbf16>, vector<8x128xf32> -> vector<8x128xf32>
      %102 = arith.addf %101, %arg13 : vector<8x128xf32>
      %cst_42 = arith.constant 0.000000e+00 : f32
      %103 = vector.broadcast %cst_42 : f32 to vector<8x128xf32>
      %104 = arith.maximumf %102, %103 : vector<8x128xf32>
      scf.yield %104 : vector<8x128xf32>
    }
    %c4_i32_13 = arith.constant 4 : i32
    %c0_14 = arith.constant 0 : index
    %c0_15 = arith.constant 0 : index
    %31 = vector.load %arg11[%c0_14, %c0_15] : memref<8x128xf32, #tpu.memory_space<vmem>>, vector<8x128xf32>
    tpu.vector_store %arg11[%c0_14, %c0_15], %30 {strides = array<i32>} : memref<8x128xf32, #tpu.memory_space<vmem>>, vector<8x128xf32>,
    return
  }
  func.func @transform_0(%arg0: i32) -> (i32, i32) {
    %c0_i32 = arith.constant 0 : i32
    %c0_i32_0 = arith.constant 0 : i32
    return %arg0, %c0_i32 : i32, i32
  }
  func.func @transform_1(%arg0: i32) -> (i32, i32) {
    %c0_i32 = arith.constant 0 : i32
    %c0_i32_0 = arith.constant 0 : i32
    %c0_i32_1 = arith.constant 0 : i32
    return %c0_i32, %c0_i32_0 : i32, i32
  }
  func.func @transform_2(%arg0: i32) -> (i32, i32) {
    %c0_i32 = arith.constant 0 : i32
    %c0_i32_0 = arith.constant 0 : i32
    %c0_i32_1 = arith.constant 0 : i32
    return %c0_i32, %c0_i32_0 : i32, i32
  }
  func.func @transform_3(%arg0: i32) -> (i32, i32) {
    %c0_i32 = arith.constant 0 : i32
    %c0_i32_0 = arith.constant 0 : i32
    %c0_i32_1 = arith.constant 0 : i32
    return %c0_i32, %c0_i32_0 : i32, i32
  }
  func.func @transform_4(%arg0: i32) -> (i32, i32, i32) {
    %c0_i32 = arith.constant 0 : i32
    %c0_i32_0 = arith.constant 0 : i32
    %c0_i32_1 = arith.constant 0 : i32
    %c0_i32_2 = arith.constant 0 : i32
    return %c0_i32, %c0_i32_0, %c0_i32_1 : i32, i32, i32
  }
  func.func @transform_5(%arg0: i32) -> (i32, i32, i32) {
    %c0_i32 = arith.constant 0 : i32
    %c0_i32_0 = arith.constant 0 : i32
    %c0_i32_1 = arith.constant 0 : i32
    %c0_i32_2 = arith.constant 0 : i32
    return %c0_i32, %c0_i32_0, %c0_i32_1 : i32, i32, i32
  }
  func.func @transform_6(%arg0: i32) -> (i32, i32, i32) {
    %c0_i32 = arith.constant 0 : i32
    %c0_i32_0 = arith.constant 0 : i32
    %c0_i32_1 = arith.constant 0 : i32
    %c0_i32_2 = arith.constant 0 : i32
    return %c0_i32, %c0_i32_0, %c0_i32_1 : i32, i32, i32
  }
  func.func @transform_7(%arg0: i32) -> (i32, i32, i32) {
    %c0_i32 = arith.constant 0 : i32
    %c0_i32_0 = arith.constant 0 : i32
    %c0_i32_1 = arith.constant 0 : i32
    %c0_i32_2 = arith.constant 0 : i32
    return %c0_i32, %c0_i32_0, %c0_i32_1 : i32, i32, i32
  }
  func.func @transform_8(%arg0: i32) -> (i32, i32, i32) {
    %c0_i32 = arith.constant 0 : i32
    %c0_i32_0 = arith.constant 0 : i32
    %c0_i32_1 = arith.constant 0 : i32
    %c0_i32_2 = arith.constant 0 : i32
    return %c0_i32, %c0_i32_0, %c0_i32_1 : i32, i32, i32
  }
  func.func @transform_9(%arg0: i32) -> (i32, i32, i32) {
    %c0_i32 = arith.constant 0 : i32
    %c0_i32_0 = arith.constant 0 : i32
    %c0_i32_1 = arith.constant 0 : i32
    %c0_i32_2 = arith.constant 0 : i32
    return %c0_i32, %c0_i32_0, %c0_i32_1 : i32, i32, i32
  }
  func.func @transform_10(%arg0: i32) -> (i32, i32) {
    %c0_i32 = arith.constant 0 : i32
    %c0_i32_0 = arith.constant 0 : i32
    return %arg0, %c0_i32 : i32, i32
  }
}

</mosaic_0001>

<bundles_post_ra>
// kernel: tpu_custom_call.1
= control target key start
LH: loop header
LB: loop body
LE: loop exit
PB: predicated region body
PF: predicated region fallthrough
CT: control target
= control target key end

     0   :  { %15 = vsyncpa [#allocation3], 0  ;;  %s1106_s0 = inlined_call_operand.hbm [shape: bf16[8,128], index: 0, kind: input, shape index: {}]   ;;  %s1107_s1 = inlined_call_operand.hbm [shape: bf16[128,128], index: 1, kind: input, shape index: {}]   ;;  %s1108_s2 = inlined_call_operand.hbm [shape: f32[1,128], index: 2, kind: input, shape index: {}]   ;;  %s1109_s3 = inlined_call_operand.hbm [shape: f32[1,128], index: 3, kind: input, shape index: {}]   ;;  %s1110_s4 = inlined_call_operand.hbm [shape: bf16[4,128,128], index: 4, kind: input, shape index: {}]   ;;  %s1111_s5 = inlined_call_operand.hbm [shape: bf16[4,128,128], index: 5, kind: input, shape index: {}]   ;;  %s1112_s6 = inlined_call_operand.vmem [shape: f32[4,1,128], index: 6, kind: input, shape index: {}]   ;;  %s1113_s7 = inlined_call_operand.hbm [shape: f32[4,1,128], index: 7, kind: input, shape index: {}]   ;;  %s1114_s8 = inlined_call_operand.hbm [shape: f32[4,1,128], index: 8, kind: input, shape index: {}]   ;;  %s1115_s9 = inlined_call_operand.vmem [shape: f32[4,1,128], index: 9, kind: input, shape index: {}]   ;;  %s1116_s10 = inlined_call_operand.hbm [shape: f32[8,128], index: 10, kind: output, shape index: {}]  }
   0x1   :  { %16 = vsyncpa [#allocation6], 0 }
   0x2   :  { %17 = vsyncpa [#allocation9], 0 }
   0x3   :  { %18 = vsyncpa [#allocation12], 0 }
   0x4   :  { %19 = vsyncpa [#allocation15], 0  ;;  %s36_s15 = sshll.u32 %s1107_s1, 4  ;;  %s37_s15 = int_to_ptr.hbm [resolvable:$true] %s36_s15 }
   0x5   :  { %20 = vsyncpa [#allocation4], 0  ;;  %s953_s16 = smov [#allocation5]   ;;  %s61_s20 = sshll.u32 %s1109_s3, 4  ;;  %s62_s20 = int_to_ptr.hbm [resolvable:$true] %s61_s20 }
   0x6   :  { %s38_s17 = sshll.u32 %s953_s16, 4  ;;  %s954_s21 = smov 64   ;;  %s39_s17 = int_to_ptr.vmem [resolvable:$true] %s38_s17 }
   0x7   :  { %s955_s22 = smov 4   ;;  %s956_s23 = smov [#allocation8]  }
   0x8   :  { %44 = dma.hbm_to_vmem [thread:$0]  %s37_s15, 1024, %s39_s17, [#allocation6], %s954_s21, %s954_s21, %s955_s22  }
   0x9   :  { %s63_s24 = sshll.u32 %s956_s23, 4  ;;  %s84_s26 = sshll.u32 %s1111_s5, 4  ;;  %s64_s24 = int_to_ptr.vmem [resolvable:$true] %s63_s24  ;;  %s85_s26 = int_to_ptr.hbm [resolvable:$true] %s84_s26 }
   0xa   :  { %66 = dma.hbm_to_vmem [thread:$0]  %s62_s20, 16, %s64_s24, [#allocation9]  }
   0xb   :  { %s26_s3 = sshll.u32 %s1106_s0, 4  ;;  %s957_s29 = smov [#allocation11]   ;;  %s27_s3 = int_to_ptr.hbm [resolvable:$true] %s26_s3 }
   0xc   :  { %s86_s30 = sshll.u32 %s957_s29, 4  ;;  %s958_s11 = smov [#allocation2]   ;;  %s87_s30 = int_to_ptr.vmem [resolvable:$true] %s86_s30 }
   0xd   :  { %92 = dma.hbm_to_vmem [thread:$0]  %s85_s26, 4096, %s87_s30, [#allocation12], %s954_s21, %s954_s21, %s955_s22  }
   0xe   :  { %s28_s12 = sshll.u32 %s958_s11, 4  ;;  %s50_s5 = sshll.u32 %s1108_s2, 4  ;;  %s29_s12 = int_to_ptr.vmem [resolvable:$true] %s28_s12  ;;  %s51_s5 = int_to_ptr.hbm [resolvable:$true] %s50_s5 }
   0xf   :  { %31 = dma.hbm_to_vmem [thread:$0]  %s27_s3, 64, %s29_s12, [#allocation3]  }
  0x10   :  { %s71_s0 = sshll.u32 %s1110_s4, 4  ;;  %s959_s17 = smov [#allocation7]   ;;  %s72_s0 = int_to_ptr.hbm [resolvable:$true] %s71_s0 }
  0x11   :  { %s52_s18 = sshll.u32 %s959_s17, 4  ;;  %s960_s19 = smov [#allocation10]   ;;  %s53_s18 = int_to_ptr.vmem [resolvable:$true] %s52_s18 }
  0x12   :  { %55 = dma.hbm_to_vmem [thread:$0]  %s51_s5, 16, %s53_s18, [#allocation6]  }
  0x13   :  { %s73_s20 = sshll.u32 %s960_s19, 4  ;;  %s99_s25 = sshll.u32 %s1113_s7, 4  ;;  %s74_s20 = int_to_ptr.vmem [resolvable:$true] %s73_s20  ;;  %s100_s25 = int_to_ptr.hbm [resolvable:$true] %s99_s25 }
  0x14   :  { %79 = dma.hbm_to_vmem [thread:$0]  %s72_s0, 4096, %s74_s20, [#allocation9], %s954_s21, %s954_s21, %s955_s22  }
  0x15   :  { %s961_s2 = smov [#allocation13]   ;;  %s112_s27 = sshll.u32 %s1114_s8, 4  ;;  %s113_s27 = int_to_ptr.hbm [resolvable:$true] %s112_s27 }
  0x16   :  { %s101_s1 = sshll.u32 %s961_s2, 4  ;;  %s962_s28 = smov 16   ;;  %s102_s1 = int_to_ptr.vmem [resolvable:$true] %s101_s1 }
  0x17   :  { %s963_s3 = smov 1   ;;  %s964_s29 = smov [#allocation14]  }
  0x18   :  { %107 = dma.hbm_to_vmem [thread:$0]  %s100_s25, 64, %s102_s1, [#allocation12], %s962_s28, %s962_s28, %s963_s3  }
  0x19   :  { %s114_s30 = sshll.u32 %s964_s29, 4  ;;  %s115_s30 = int_to_ptr.vmem [resolvable:$true] %s114_s30 }
  0x1a   :  { %120 = dma.hbm_to_vmem [thread:$0]  %s113_s27, 64, %s115_s30, [#allocation15], %s962_s28, %s962_s28, %s963_s3  }
  0x1b   :  { %933 = dma.done.wait [#allocation3], 64  }
  0x1c   :  { %934 = vsyncadd [#allocation3], 4294967232 }
  0x1d   :  { %935 = dma.done.wait [#allocation6], 1040  }
  0x1e   :  { %936 = vsyncadd [#allocation6], 4294966256 }
  0x1f   :  { %937 = dma.done.wait [#allocation9], 4112  }
  0x20   :  { %938 = vsyncadd [#allocation9], 4294963184 }
  0x21   :  { %939 = dma.done.wait [#allocation12], 4160  }
  0x22   :  { %940 = vsyncadd [#allocation12], 4294963136 }
  0x23   :  { %941 = dma.done.wait [#allocation15], 64  }
  0x24   :  { %942 = vsyncadd [#allocation15], 4294967232  ;;  %v649_v0 = vld [vmem:[#allocation5 + $0x38] sm:$0xff]  ;;  %v648_v1 = vld [vmem:[#allocation5 + $0x30] sm:$0xff]  ;;  %s1056_s7 = smov 0  }
  0x25   :  { %220 = vmatpush.bf16.msra.mxu0 %v649_v0  ;;  %v647_v2 = vld [vmem:[#allocation5 + $0x28] sm:$0xff]  ;;  %v646_v3 = vld [vmem:[#allocation5 + $0x20] sm:$0xff]  ;;  %v645_v4 = vld [vmem:[#allocation5 + $0x18] sm:$0xff] }
  0x26   :  { %v644_v5 = vld [vmem:[#allocation5 + $0x10] sm:$0xff]  ;;  %v643_v6 = vld [vmem:[#allocation5 + $0x8] sm:$0xff]  ;;  %v642_v7 = vld [vmem:[#allocation5] sm:$0xff] }
  0x27   :  { %v155_v8 = vld [vmem:[#allocation2] sm:$0xf]  ;;  %v697_v26 = vld [vmem:[#allocation7] ss:$0 sm:$0xff]  ;;  %v698_v28 = vld [vmem:[#allocation8] ss:$0 sm:$0xff] }
  0x29   :  { %221 = vmatpush.bf16.msra.mxu0 %v648_v1 }
  0x2d   :  { %222 = vmatpush.bf16.msra.mxu0 %v647_v2 }
  0x31   :  { %223 = vmatpush.bf16.msra.mxu0 %v646_v3 }
  0x35   :  { %224 = vmatpush.bf16.msra.mxu0 %v645_v4 }
  0x39   :  { %225 = vmatpush.bf16.msra.mxu0 %v644_v5 }
  0x3d   :  { %226 = vmatpush.bf16.msra.mxu0 %v643_v6 }
  0x41   :  { %227 = vmatpush.bf16.msra.mxu0 %v642_v7 }
  0x44   :  { %228 = vmatmul.bf16.vlgmr.msra.gmra.mxu0 %v155_v8 }
  0xc1   :  { %v229_v9 = vpop.f32.mrf.mxu0 }
  0xc2   :  { %235 = vadd.xlane.f32.xlu0 %v229_v9  ;;  %v237_v10 = vmul.f32 %v229_v9, %v229_v9 }
  0xc9   :  { %v231_v11 = vpop.f32.mrf.mxu0 }
  0xca   :  { %238 = vadd.xlane.f32.xlu0 %v237_v10 }
 0x135   :  { %v236_v12 = vpop.xlane.xlu0 %235 }
 0x136   :  { %v240_v13 = vmul.f32 0.015625, %v236_v12 }
 0x138   :  { %v242_v15 = vmul.f32 %v240_v13, %v240_v13  ;;  %v255_v25 = vsub.f32 %v229_v9, %v240_v13 }
 0x13d   :  { %v239_v14 = vpop.xlane.xlu0 %238 }
 0x13e   :  { %v241_v16 = vmul.f32 0.015625, %v239_v14 }
 0x140   :  { %v243_v17 = vsub.f32 %v241_v16, %v242_v15 }
 0x142   :  { %v244_v18 = vadd.f32 1e-05, %v243_v17 }
 0x144   :  { %699 = vrsqrt.f32 %v244_v18  ;;  %vm251_vm1 = vweird.f32 %v244_v18 }
 0x14a   :  { %v700_v19 = vpop.eup %699 }
 0x14b   :  { %v246_v20 = vmul.f32 %v700_v19, %v244_v18  ;;  %vm252_vm0 = vweird.f32 %v700_v19 }
 0x14c   :  { %vm253_vm2 = vmor %vm251_vm1, %vm252_vm0 }
 0x14d   :  { %v247_v21 = vmul.f32 %v700_v19, %v246_v20 }
 0x14f   :  { %v248_v22 = vmul.f32 0.5, %v247_v21 }
 0x151   :  { %v249_v23 = vsub.f32 1.5, %v248_v22 }
 0x153   :  { %v250_v24 = vmul.f32 %v700_v19, %v249_v23 }
 0x155   :  { %v254_v27 = vsel %vm253_vm2, %v700_v19, %v250_v24 }
 0x156   :  { %v256_v29 = vmul.f32 %v255_v25, %v254_v27 }
 0x158   :  { %v260_v30 = vmul.f32 %v697_v26, %v256_v29 }
 0x15a   :  { %v264_v31 = vadd.f32 %v698_v28, %v260_v30 }
 0x15c   :  { %v265_v32 = vmax.f32 %v264_v31, 0.0  }
 0x15d LB: > { %277 = vadd.xlane.f32.xlu0 %v947_v32  ;;  %v279_v33 = vmul.f32 %v947_v32, %v947_v32  ;;  %s273_s22 = scalar_lea.vmem %s1112_s6, %s951_s7  ;;  %s275_s11 = scalar_lea.vmem [#allocation13], %s951_s7  ;;  %s951_s7 = sphi %s1056_s7, %s271_s7   ;;  %v947_v32 = vphi %v265_v32, %v1117_v32  }
 0x15e   : > { %s650_s12 = sshll.u32 %s951_s7, 6  ;;  %v701_v56 = vld [vmem:[%s273_s22] ss:$0 sm:$0xff]  ;;  %s391_s0 = scalar_lea.vmem %s1115_s9, %s951_s7 }
 0x15f   : > { %s311_s13 = scalar_lea.vmem [#allocation10], %s650_s12  ;;  %v702_v59 = vld [vmem:[%s275_s11] ss:$0 sm:$0xff]  ;;  %s389_s17 = scalar_lea.vmem [#allocation14], %s951_s7 }
 0x160   : > { %v658_v34 = vld [vmem:[%s311_s13 + $0x38] sm:$0xff]  ;;  %v657_v35 = vld [vmem:[%s311_s13 + $0x30] sm:$0xff]  ;;  %v656_v36 = vld [vmem:[%s311_s13 + $0x28] sm:$0xff]  ;;  %s426_s18 = scalar_lea.vmem [#allocation11], %s650_s12  ;;  %s271_s7 = sadd.s32 1, %s951_s7  }
 0x161   : > { %376 = vmatpush.bf16.msra.mxu0 %v658_v34  ;;  %v655_v37 = vld [vmem:[%s311_s13 + $0x20] sm:$0xff]  ;;  %v654_v38 = vld [vmem:[%s311_s13 + $0x18] sm:$0xff]  ;;  %v653_v39 = vld [vmem:[%s311_s13 + $0x10] sm:$0xff]  ;;  %p268_p0 = scmp.ge.s32.totalorder %s271_s7, 4  }
 0x162   : > { %v652_v41 = vld [vmem:[%s311_s13 + $0x8] sm:$0xff]  ;;  %v651_v42 = vld [vmem:[%s311_s13] sm:$0xff]  ;;  %v667_v3 = vld [vmem:[%s426_s18 + $0x38] sm:$0xff]  ;;  %s513_s25 = sshll.u32 (%p268_p0), %s1116_s10, 4  ;;  %s965_s2 = smov (%p268_p0), [#allocation16]   ;;  %s514_s25 = int_to_ptr.hbm [resolvable:$true] %s513_s25 }
 0x163   : > { %491 = vmatpush.bf16.msra.mxu1 %v667_v3  ;;  %v666_v4 = vld [vmem:[%s426_s18 + $0x30] sm:$0xff]  ;;  %v665_v5 = vld [vmem:[%s426_s18 + $0x28] sm:$0xff]  ;;  %v664_v6 = vld [vmem:[%s426_s18 + $0x20] sm:$0xff]  ;;  %s511_s1 = sshll.u32 (%p268_p0), %s965_s2, 4  ;;  %s512_s1 = int_to_ptr.vmem [resolvable:$true] %s511_s1 }
 0x164   : > { %v663_v7 = vld [vmem:[%s426_s18 + $0x18] sm:$0xff]  ;;  %v662_v8 = vld [vmem:[%s426_s18 + $0x10] sm:$0xff]  ;;  %v661_v10 = vld [vmem:[%s426_s18 + $0x8] sm:$0xff] }
 0x165   : > { %280 = vadd.xlane.f32.xlu0 %v279_v33  ;;  %377 = vmatpush.bf16.msra.mxu0 %v657_v35  ;;  %v660_v11 = vld [vmem:[%s426_s18] sm:$0xff] }
 0x166   : > { %v703_v25 = vld [vmem:[%s389_s17] ss:$0 sm:$0xff] }
 0x167   : > { %492 = vmatpush.bf16.msra.mxu1 %v666_v4  ;;  %v704_v28 = vld [vmem:[%s391_s0] ss:$0 sm:$0xff] }
 0x169   : > { %378 = vmatpush.bf16.msra.mxu0 %v656_v36 }
 0x16b   : > { %493 = vmatpush.bf16.msra.mxu1 %v665_v5 }
 0x16d   : > { %379 = vmatpush.bf16.msra.mxu0 %v655_v37 }
 0x16f   : > { %494 = vmatpush.bf16.msra.mxu1 %v664_v6 }
 0x171   : > { %380 = vmatpush.bf16.msra.mxu0 %v654_v38 }
 0x173   : > { %495 = vmatpush.bf16.msra.mxu1 %v663_v7 }
 0x175   : > { %381 = vmatpush.bf16.msra.mxu0 %v653_v39 }
 0x177   : > { %496 = vmatpush.bf16.msra.mxu1 %v662_v8 }
 0x179   : > { %382 = vmatpush.bf16.msra.mxu0 %v652_v41 }
 0x17b   : > { %497 = vmatpush.bf16.msra.mxu1 %v661_v10 }
 0x17d   : > { %383 = vmatpush.bf16.msra.mxu0 %v651_v42 }
 0x17f   : > { %498 = vmatpush.bf16.msra.mxu1 %v660_v11 }
 0x1d0   : > { %v278_v40 = vpop.xlane.xlu0 %277 }
 0x1d1   : > { %v282_v43 = vmul.f32 0.015625, %v278_v40 }
 0x1d3   : > { %v284_v45 = vmul.f32 %v282_v43, %v282_v43  ;;  %v297_v55 = vsub.f32 %v947_v32, %v282_v43 }
 0x1d8   : > { %v281_v44 = vpop.xlane.xlu0 %280 }
 0x1d9   : > { %v283_v46 = vmul.f32 0.015625, %v281_v44 }
 0x1db   : > { %v285_v47 = vsub.f32 %v283_v46, %v284_v45 }
 0x1dd   : > { %v286_v48 = vadd.f32 1e-05, %v285_v47 }
 0x1df   : > { %705 = vrsqrt.f32 %v286_v48  ;;  %vm293_vm4 = vweird.f32 %v286_v48 }
 0x1e5   : > { %v706_v49 = vpop.eup %705 }
 0x1e6   : > { %v288_v50 = vmul.f32 %v706_v49, %v286_v48  ;;  %vm294_vm3 = vweird.f32 %v706_v49 }
 0x1e7   : > { %vm295_vm5 = vmor %vm293_vm4, %vm294_vm3 }
 0x1e8   : > { %v289_v51 = vmul.f32 %v706_v49, %v288_v50 }
 0x1ea   : > { %v290_v52 = vmul.f32 0.5, %v289_v51 }
 0x1ec   : > { %v291_v53 = vsub.f32 1.5, %v290_v52 }
 0x1ee   : > { %v292_v54 = vmul.f32 %v706_v49, %v291_v53 }
 0x1f0   : > { %v296_v57 = vsel %vm295_vm5, %v706_v49, %v292_v54 }
 0x1f1   : > { %v298_v58 = vmul.f32 %v297_v55, %v296_v57 }
 0x1f3   : > { %v302_v60 = vmul.f32 %v701_v56, %v298_v58 }
 0x1f5   : > { %v306_v61 = vadd.f32 %v702_v59, %v302_v60 }
 0x1f7   : > { %v307_v62 = vmax.f32 %v306_v61, 0.0 }
 0x1f9   : > { %v308_v63 = vpack.c.bf16 %v307_v62, %v307_v62 }
 0x1fb   : > { %384 = vmatmul.bf16.vlgmr.msra.gmra.mxu0 %v308_v63 }
 0x278   : > { %v385_v0 = vpop.f32.mrf.mxu0 }
 0x279   : > { %393 = vadd.xlane.f32.xlu1 %v385_v0  ;;  %v395_v1 = vmul.f32 %v385_v0, %v385_v0 }
 0x280   : > { %v387_v2 = vpop.f32.mrf.mxu0 }
 0x281   : > { %396 = vadd.xlane.f32.xlu1 %v395_v1 }
 0x2ec   : > { %v394_v9 = vpop.xlane.xlu1 %393 }
 0x2ed   : > { %v398_v12 = vmul.f32 0.015625, %v394_v9 }
 0x2ef   : > { %v400_v14 = vmul.f32 %v398_v12, %v398_v12  ;;  %v413_v24 = vsub.f32 %v385_v0, %v398_v12 }
 0x2f4   : > { %v397_v13 = vpop.xlane.xlu1 %396 }
 0x2f5   : > { %v399_v15 = vmul.f32 0.015625, %v397_v13 }
 0x2f7   : > { %v401_v16 = vsub.f32 %v399_v15, %v400_v14 }
 0x2f9   : > { %v402_v17 = vadd.f32 1e-05, %v401_v16 }
 0x2fb   : > { %707 = vrsqrt.f32 %v402_v17  ;;  %vm409_vm7 = vweird.f32 %v402_v17 }
 0x301   : > { %v708_v18 = vpop.eup %707 }
 0x302   : > { %v404_v19 = vmul.f32 %v708_v18, %v402_v17  ;;  %vm410_vm6 = vweird.f32 %v708_v18 }
 0x303   : > { %vm411_vm8 = vmor %vm409_vm7, %vm410_vm6 }
 0x304   : > { %v405_v20 = vmul.f32 %v708_v18, %v404_v19 }
 0x306   : > { %v406_v21 = vmul.f32 0.5, %v405_v20 }
 0x308   : > { %v407_v22 = vsub.f32 1.5, %v406_v21 }
 0x30a   : > { %v408_v23 = vmul.f32 %v708_v18, %v407_v22 }
 0x30c   : > { %v412_v26 = vsel %vm411_vm8, %v708_v18, %v408_v23 }
 0x30d   : > { %v414_v27 = vmul.f32 %v413_v24, %v412_v26 }
 0x30f   : > { %v418_v29 = vmul.f32 %v703_v25, %v414_v27 }
 0x311   : > { %v422_v30 = vadd.f32 %v704_v28, %v418_v29 }
 0x313   : > { %v423_v31 = vmax.f32 %v422_v30, 0.0 }
 0x315   : > { %v424_v33 = vpack.c.bf16 %v423_v31, %v423_v31 }
 0x317   : > { %499 = vmatmul.bf16.vlgmr.msra.gmra.mxu1 %v424_v33 }
 0x394   : > { %v500_v34 = vpop.f32.mrf.mxu1 }
 0x395   : > { %v501_v35 = vadd.f32 %v947_v32, %v500_v34 }
 0x397   : > { %v504_v36 = vmax.f32 %v501_v35, 0.0  }
 0x398   :  { %270 = sbr.rel (!%p268_p0) target bundleno = 349 (0x15d), region = 105 }
 0x399   : > { %v1117_v32 = vmov %v504_v36  ;;  %505 = vst [vmem:[#allocation16] sm:$0xff] (%p268_p0), %v504_v36 }
 0x39a   :  { %516 = dma.vmem_to_hbm [thread:$0]  (%p268_p0), %s512_s1, 128, %s514_s25, [#allocation4]  }
 0x39c   : > { %v502_v37 = vpop.f32.mrf.mxu1 }
 0x39d   :  { %943 = dma.done.wait [#allocation4], 128  }
 0x39e   :  { %944 = vsyncadd [#allocation4], 4294967168 }
 0x39f   :  { %521 = vsyncpa [#allocation3], 1 }
 0x3a0   :  { %522 = vsyncpa [#allocation6], 1 }
 0x3a1   :  { %523 = vsyncpa [#allocation9], 1 }
 0x3a2   :  { %524 = vsyncpa [#allocation12], 1 }
 0x3a3   :  { %525 = vsyncpa [#allocation15], 1 }
 0x3a4   :  { %526 = vsyncpa [#allocation4], 1 }

</bundles_post_ra>
